<compile_context>
chip_gen: v6e
topology: v6e:2x2x1
jax: 0.10.0
libtpu: 0.0.40
codegen_flags: <defaults>
</compile_context>

<pallas_src>
import functools

import jax
import jax.numpy as jnp
from jax.experimental import pallas as pl
from jax.experimental.pallas import tpu as pltpu

_MIB = 1024 * 1024


def _vmem_capacity_bytes():
    """Physical VMEM per core; conservative 64 MiB (v7x) fallback."""
    try:
        info = pltpu.get_tpu_info()
        cap = getattr(info, "vmem_capacity_bytes", None)
        if cap:
            return int(cap)
    except Exception:
        pass
    return 64 * _MIB


def _round_up(x, m):
    return ((x + m - 1) // m) * m


def _pick_tile(n, preferred, *, min_blocks=1):
    """Largest candidate dividing n while keeping at least `min_blocks` blocks."""
    for c in preferred:
        if c <= n and n % c == 0 and n // c >= min_blocks:
            return c
    return n


def _xw_kernel(x_ref, w_ref, o_ref):
    """Row-tiled dense transform o = x @ w (bf16 MXU, f32 accumulation)."""
    o_ref[...] = jnp.dot(x_ref[...], w_ref[...],
                         preferred_element_type=jnp.float32).astype(o_ref.dtype)


def _gcn_agg_kernel(*refs, apply_weight, x_resident, tk):
    """Streaming aggregation over the src (K) axis with a resident f32 accumulator.

    grid = (N/tm, N/tk); axis 0 (dst rows) is parallel, axis 1 (src) is the
    reduction.  acc holds sum_k A[i,k] @ X[k]; the in-degree (row-sum of A) is
    accumulated in the same pass.  At the last K step the dense transform (if
    not already applied), the dst-side rsqrt normalization and the bias are
    applied and the lane-dense (tm, Fout_pad) tile is stored.
    """
    if apply_weight:
        a_ref, x_ref, w_ref, b_ref, o_ref, acc_ref, deg_ref = refs
    else:
        a_ref, x_ref, b_ref, o_ref, acc_ref, deg_ref = refs
        w_ref = None

    k = pl.program_id(1)

    @pl.when(k == 0)
    def _init():
        acc_ref[...] = jnp.zeros_like(acc_ref)
        deg_ref[...] = jnp.zeros_like(deg_ref)

    # int8 {0,1} adjacency -> bf16 right before the MXU (exact, VPU work hidden
    # under the DMA).  Never feed int8 to the MXU directly (no int MXU on v7x).
    a_bf16 = a_ref[...].astype(jnp.bfloat16)

    if x_resident:
        start = pl.multiple_of(k * tk, tk)
        x_tile = x_ref[pl.ds(start, tk), :]
    else:
        x_tile = x_ref[...]

    acc_ref[...] += jnp.dot(a_bf16, x_tile, preferred_element_type=jnp.float32)
    # dst in-degree fused into the same A pass (XLU reduce, free slot).
    deg_ref[...] += jnp.sum(a_bf16.astype(jnp.float32), axis=1, keepdims=True)

    @pl.when(k == pl.num_programs(1) - 1)
    def _finalize():
        acc = acc_ref[...]
        if apply_weight:  # aggregate-first path: bf16 transform once per dst tile
            acc = jnp.dot(acc.astype(jnp.bfloat16), w_ref[...],
                          preferred_element_type=jnp.float32)
        norm_dst = jax.lax.rsqrt(jnp.maximum(deg_ref[...], 1.0))   # clamp(min=1)
        o_ref[...] = (acc * norm_dst + b_ref[...]).astype(o_ref.dtype)


def gcn_preprocess(adj, *, pad_to=256):
    """One-time (static-graph) preprocessing.

    adj[dst, src] is a dense 0/1 adjacency (self loops already added).
    Returns the zero-padded int8 adjacency and the src-side (out-degree)
    rsqrt normalization -- the only full adjacency passes outside the kernel.
    """
    n = adj.shape[0]
    n_pad = max(pad_to, _round_up(n, pad_to))
    deg_out = jnp.clip(jnp.sum(adj.astype(jnp.float32), axis=0), 1.0, None)
    norm_src = jax.lax.rsqrt(deg_out)[:, None]                       # (n, 1)
    adj_i8 = jnp.zeros((n_pad, n_pad), jnp.int8).at[:n, :n].set(
        adj.astype(jnp.int8))
    return adj_i8, norm_src


def gcn_forward(adj_i8, norm_src, feat, weight, bias, *, tm=None, tk=None,
                out_dtype=jnp.float32):
    """GCN forward (norm='both').  adj_i8 [N_pad, N_pad] int8 0/1 (dst, src),
    norm_src [N, 1], feat [N, Fin], weight [Fin, Fout], bias [Fout]."""
    n_pad = adj_i8.shape[0]
    n, fin = feat.shape
    fin_w, fout = weight.shape
    assert fin_w == fin and norm_src.shape[0] == n and n_pad >= n

    # --- lane-dense output: pad Fout up to a multiple of 128 ---
    fout_pad = _round_up(max(fout, 128), 128)
    w_bf16 = jnp.zeros((fin, fout_pad), jnp.bfloat16).at[:, :fout].set(
        weight.astype(jnp.bfloat16))
    b_pad = jnp.zeros((1, fout_pad), jnp.float32).at[0, :fout].set(
        bias.astype(jnp.float32).reshape(-1))

    # src-side normalization folded into the features (DGL order), rows padded.
    feat_src = feat.astype(jnp.float32) * norm_src
    feat_src = jnp.zeros((n_pad, fin), jnp.float32).at[:n, :].set(feat_src)

    # transform order chosen by padded MXU lane occupancy (math-equivalent).
    lane_tiles = lambda f: (f + 127) // 128
    transform_first = lane_tiles(fin) > lane_tiles(fout)

    if transform_first:
        # Dense transform first (small row-tiled bf16 matmul), then aggregate.
        tmx = _pick_tile(n_pad, (512, 256, 128, 64, 32, 16, 8))
        x_stream = pl.pallas_call(
            _xw_kernel,
            out_shape=jax.ShapeDtypeStruct((n_pad, fout_pad), jnp.bfloat16),
            grid=(n_pad // tmx,),
            in_specs=[pl.BlockSpec((tmx, fin), lambda i: (i, 0)),
                      pl.BlockSpec((fin, fout_pad), lambda i: (0, 0))],
            out_specs=pl.BlockSpec((tmx, fout_pad), lambda i: (i, 0)),
            compiler_params=pltpu.CompilerParams(
                dimension_semantics=("parallel",)),
        )(feat_src.astype(jnp.bfloat16), w_bf16)
        f_stream = fout_pad
    else:
        x_stream = feat_src.astype(jnp.bfloat16)
        f_stream = fin

    # --- tile sizes: big dst tiles, >=2 dst blocks (megacore), int8-aligned ---
    if tm is None:
        tm = _pick_tile(n_pad, (1024, 512, 256, 128, 64, 32), min_blocks=2)
    if tk is None:
        tk = _pick_tile(n_pad, (1024, 512, 256, 128))

    apply_weight = not transform_first

    # --- VMEM budget (per generation) and resident-X decision ---
    vmem_cap = _vmem_capacity_bytes()
    vmem_limit = min(int(vmem_cap * 0.75), 96 * _MIB)
    fixed_bytes = (2 * tm * tk                       # A tile, int8, dbl-buffered
                   + tm * f_stream * 4 + tm * 4      # acc + deg scratch
                   + 2 * tm * fout_pad * 4           # output, dbl-buffered
                   + (2 * fin * fout_pad * 2 if apply_weight else 0)
                   + 2 * fout_pad * 4)               # bias
    x_full_bytes = n_pad * f_stream * 2              # bf16 full feature matrix
    x_resident = (fixed_bytes + 2 * x_full_bytes) <= (vmem_limit - 4 * _MIB)

    if x_resident:
        x_spec = pl.BlockSpec((n_pad, f_stream), lambda i, k: (0, 0))
    else:
        x_spec = pl.BlockSpec((tk, f_stream), lambda i, k: (k, 0))

    in_specs = [pl.BlockSpec((tm, tk), lambda i, k: (i, k)),   # int8 adjacency
                x_spec]                                        # scaled features
    args = [adj_i8, x_stream]
    if apply_weight:
        in_specs.append(pl.BlockSpec((fin, fout_pad), lambda i, k: (0, 0)))
        args.append(w_bf16)
    in_specs.append(pl.BlockSpec((1, fout_pad), lambda i, k: (0, 0)))
    args.append(b_pad)

    kernel = functools.partial(_gcn_agg_kernel, apply_weight=apply_weight,
                               x_resident=x_resident, tk=tk)

    out_pad = pl.pallas_call(
        kernel,
        out_shape=jax.ShapeDtypeStruct((n_pad, fout_pad), out_dtype),
        grid_spec=pltpu.PrefetchScalarGridSpec(
            num_scalar_prefetch=0,
            grid=(n_pad // tm, n_pad // tk),
            in_specs=in_specs,
            out_specs=pl.BlockSpec((tm, fout_pad), lambda i, k: (i, 0)),
            scratch_shapes=[pltpu.VMEM((tm, f_stream), jnp.float32),
                            pltpu.VMEM((tm, 1), jnp.float32)]),
        compiler_params=pltpu.CompilerParams(
            dimension_semantics=("parallel", "arbitrary"),
            vmem_limit_bytes=vmem_limit),
    )(*args)
    # TODO(synk): if the profile shows exposed DMA at step boundaries, add
    # pipeline_mode=pl.Buffered(3) on the adjacency BlockSpec (cheap on
    # v5e/v6e; re-check against the 64 MiB v7x budget).

    if n_pad != n or fout_pad != fout:
        return out_pad[:n, :fout]
    return out_pad
    # TODO(synk): optional edge_weight (u_mul_e) aggregation, batch_norm and
    # activation branches are disabled by the module defaults and not emitted.
    # TODO(synk): genuinely-sparse graphs would use a CSR / scalar-prefetch
    # gather variant instead of streaming a dense adjacency.


def gcn_layer(adj, feat, weight, bias):
    """Convenience wrapper: one-shot preprocess + forward."""
    adj_i8, norm_src = gcn_preprocess(adj)
    return gcn_forward(adj_i8, norm_src, feat, weight, bias)


def gcn_reference(adj, feat, weight, bias):
    """Plain-JAX f32 reference mirroring the torch/DGL op order (norm='both')."""
    deg_out = jnp.clip(jnp.sum(adj, axis=0), 1.0, None)
    deg_in = jnp.clip(jnp.sum(adj, axis=1), 1.0, None)
    feat_src = feat * (deg_out ** -0.5)[:, None]
    if feat.shape[1] > weight.shape[1]:
        rst = adj @ (feat_src @ weight)
    else:
        rst = (adj @ feat_src) @ weight
    rst = rst * (deg_in ** -0.5)[:, None]
    return rst + bias[None, :]


if __name__ == "__main__":
    N, IN_FEATS, OUT_FEATS = 128, 64, 32

    key = jax.random.PRNGKey(0)
    k_adj, k_feat, k_w = jax.random.split(key, 3)

    # Random sparse-ish directed graph + self loops (avoids 0 in-degree).
    adj = (jax.random.uniform(k_adj, (N, N)) < 0.1).astype(jnp.float32)
    adj = jnp.maximum(adj, jnp.eye(N, dtype=jnp.float32))   # A[dst, src]

    feat = jax.random.normal(k_feat, (N, IN_FEATS), dtype=jnp.float32)

    # Deterministic xavier_uniform_ init for the weight, zeros for the bias.
    bound = (6.0 / (IN_FEATS + OUT_FEATS)) ** 0.5
    weight = jax.random.uniform(
        k_w, (IN_FEATS, OUT_FEATS), dtype=jnp.float32,
        minval=-bound, maxval=bound)
    bias = jnp.zeros((OUT_FEATS,), dtype=jnp.float32)

    # allow_zero_in_degree=False check (host-side glue, matches the raise).
    assert bool(jnp.all(jnp.sum(adj, axis=1) > 0)), "zero in-degree node found"

    # One-time (static graph) preprocessing, then the hot forward pass.
    adj_i8, norm_src = gcn_preprocess(adj)
    out = gcn_forward(adj_i8, norm_src, feat, weight, bias)
    out = jax.block_until_ready(out)

    ref = gcn_reference(adj, feat, weight, bias)
    assert out.shape == (N, OUT_FEATS)
    # bf16 streaming of adjacency/features -> bf16-level tolerance vs f32 ref.
    assert jnp.allclose(out, ref, atol=2e-2, rtol=2e-2), "mismatch vs reference"

    print("KERNEL_OK")
</pallas_src>

<mosaic_0001>
module attributes {stable_mosaic.version = 11 : i64} {
  func.func @_gcn_agg_kernel(%arg0: i32, %arg1: i32, %arg2: memref<128x256xi8, #tpu.memory_space<vmem>>, %arg3: memref<256x64xbf16, #tpu.memory_space<vmem>>, %arg4: memref<64x128xbf16, #tpu.memory_space<vmem>>, %arg5: memref<1x128xf32, #tpu.memory_space<vmem>>, %arg6: memref<128x128xf32, #tpu.memory_space<vmem>>, %arg7: memref<128x64xf32, #tpu.memory_space<vmem>>, %arg8: memref<128x1xf32, #tpu.memory_space<vmem>>) attributes {dimension_semantics = [#tpu.dimension_semantics<parallel>, #tpu.dimension_semantics<arbitrary>], iteration_bounds = array<i64: 2, 1>, scalar_prefetch = 0 : i64, scratch_operands = 2 : i64, tpu.core_type = #tpu.core_type<tc>, window_params = [{transform_indices = @transform_0, window_bounds = array<i64: 128, 256>}, {pipeline_mode = #tpu.pipeline_mode<synchronous>, transform_indices = @transform_1, window_bounds = array<i64: 256, 64>}, {pipeline_mode = #tpu.pipeline_mode<synchronous>, transform_indices = @transform_2, window_bounds = array<i64: 64, 128>}, {pipeline_mode = #tpu.pipeline_mode<synchronous>, transform_indices = @transform_3, window_bounds = array<i64: 1, 128>}, {transform_indices = @transform_4, window_bounds = array<i64: 128, 128>}]} {
    %c0_i32 = arith.constant 0 : i32
    %0 = arith.cmpi eq, %arg1, %c0_i32 : i32
    %1 = arith.extui %0 : i1 to i32
    %c0_i32_0 = arith.constant 0 : i32
    %2 = arith.cmpi ne, %1, %c0_i32_0 : i32
    scf.if %2 {
      %cst_14 = arith.constant 0.000000e+00 : f32
      %22 = vector.broadcast %cst_14 : f32 to vector<128x64xf32>
      %c0_15 = arith.constant 0 : index
      %c0_16 = arith.constant 0 : index
      %23 = vector.load %arg7[%c0_15, %c0_16] : memref<128x64xf32, #tpu.memory_space<vmem>>, vector<128x64xf32>
      tpu.vector_store %arg7[%c0_15, %c0_16], %22 {strides = array<i32>} : memref<128x64xf32, #tpu.memory_space<vmem>>, vector<128x64xf32>,
      %cst_17 = arith.constant 0.000000e+00 : f32
      %24 = vector.broadcast %cst_17 : f32 to vector<128x1xf32>
      %c0_18 = arith.constant 0 : index
      %c0_19 = arith.constant 0 : index
      %25 = vector.load %arg8[%c0_18, %c0_19] : memref<128x1xf32, #tpu.memory_space<vmem>>, vector<128x1xf32>
      tpu.vector_store %arg8[%c0_18, %c0_19], %24 {strides = array<i32>} : memref<128x1xf32, #tpu.memory_space<vmem>>, vector<128x1xf32>,
    } else {
    }
    %c0 = arith.constant 0 : index
    %c0_1 = arith.constant 0 : index
    %3 = vector.load %arg2[%c0, %c0_1] : memref<128x256xi8, #tpu.memory_space<vmem>>, vector<128x256xi8>
    %4 = arith.sitofp %3 : vector<128x256xi8> to vector<128x256xbf16>
    %c256_i32 = arith.constant 256 : i32
    %5 = arith.muli %arg1, %c256_i32 : i32
    %6 = tpu.assume_multiple %5, 256 : i32
    %7 = arith.index_cast %6 : i32 to index
    %c0_2 = arith.constant 0 : index
    %8 = vector.load %arg3[%7, %c0_2] : memref<256x64xbf16, #tpu.memory_space<vmem>>, vector<256x64xbf16>
    %c0_3 = arith.constant 0 : index
    %c0_4 = arith.constant 0 : index
    %9 = vector.load %arg7[%c0_3, %c0_4] : memref<128x64xf32, #tpu.memory_space<vmem>>, vector<128x64xf32>
    %cst = arith.constant dense<0.000000e+00> : vector<128x64xf32>
    %10 = tpu.matmul %4, %8, %cst {dimension_numbers = #tpu.dot_dimension_numbers<[1], [0], [0], [1], [0, 0, 1, 1], [], []>} : vector<128x256xbf16>, vector<256x64xbf16>, vector<128x64xf32> -> vector<128x64xf32>
    %11 = arith.addf %9, %10 : vector<128x64xf32>
    %c0_5 = arith.constant 0 : index
    %c0_6 = arith.constant 0 : index
    %12 = vector.load %arg7[%c0_5, %c0_6] : memref<128x64xf32, #tpu.memory_space<vmem>>, vector<128x64xf32>
    tpu.vector_store %arg7[%c0_5, %c0_6], %11 {strides = array<i32>} : memref<128x64xf32, #tpu.memory_space<vmem>>, vector<128x64xf32>,
    %c0_7 = arith.constant 0 : index
    %c0_8 = arith.constant 0 : index
    %13 = vector.load %arg8[%c0_7, %c0_8] : memref<128x1xf32, #tpu.memory_space<vmem>>, vector<128x1xf32>
    %14 = arith.extf %4 : vector<128x256xbf16> to vector<128x256xf32>
    %cst_9 = arith.constant dense<0.000000e+00> : vector<128xf32>
    %15 = vector.multi_reduction <add>, %14, %cst_9 [1] : vector<128x256xf32> to vector<128xf32>
    %16 = vector.shape_cast %15 : vector<128xf32> to vector<128x1xf32>
    %17 = arith.addf %13, %16 : vector<128x1xf32>
    %c0_10 = arith.constant 0 : index
    %c0_11 = arith.constant 0 : index
    %18 = vector.load %arg8[%c0_10, %c0_11] : memref<128x1xf32, #tpu.memory_space<vmem>>, vector<128x1xf32>
    tpu.vector_store %arg8[%c0_10, %c0_11], %17 {strides = array<i32>} : memref<128x1xf32, #tpu.memory_space<vmem>>, vector<128x1xf32>,
    %c0_i32_12 = arith.constant 0 : i32
    %19 = arith.cmpi eq, %arg1, %c0_i32_12 : i32
    %20 = arith.extui %19 : i1 to i32
    %c0_i32_13 = arith.constant 0 : i32
    %21 = arith.cmpi ne, %20, %c0_i32_13 : i32
    scf.if %21 {
      %c0_14 = arith.constant 0 : index
      %c0_15 = arith.constant 0 : index
      %22 = vector.load %arg7[%c0_14, %c0_15] : memref<128x64xf32, #tpu.memory_space<vmem>>, vector<128x64xf32>
      %23 = arith.truncf %22 : vector<128x64xf32> to vector<128x64xbf16>
      %c0_16 = arith.constant 0 : index
      %c0_17 = arith.constant 0 : index
      %24 = vector.load %arg4[%c0_16, %c0_17] : memref<64x128xbf16, #tpu.memory_space<vmem>>, vector<64x128xbf16>
      %cst_18 = arith.constant dense<0.000000e+00> : vector<128x128xf32>
      %25 = tpu.matmul %23, %24, %cst_18 {dimension_numbers = #tpu.dot_dimension_numbers<[1], [0], [0], [1], [0, 0, 1, 1], [], []>} : vector<128x64xbf16>, vector<64x128xbf16>, vector<128x128xf32> -> vector<128x128xf32>
      %c0_19 = arith.constant 0 : index
      %c0_20 = arith.constant 0 : index
      %26 = vector.load %arg8[%c0_19, %c0_20] : memref<128x1xf32, #tpu.memory_space<vmem>>, vector<128x1xf32>
      %cst_21 = arith.constant 1.000000e+00 : f32
      %27 = vector.broadcast %cst_21 : f32 to vector<128x1xf32>
      %28 = arith.maximumf %26, %27 : vector<128x1xf32>
      %29 = math.rsqrt %28 : vector<128x1xf32>
      %30 = vector.broadcast %29 : vector<128x1xf32> to vector<128x128xf32>
      %31 = arith.mulf %25, %30 : vector<128x128xf32>
      %c0_22 = arith.constant 0 : index
      %c0_23 = arith.constant 0 : index
      %32 = vector.load %arg5[%c0_22, %c0_23] : memref<1x128xf32, #tpu.memory_space<vmem>>, vector<1x128xf32>
      %33 = vector.broadcast %32 : vector<1x128xf32> to vector<128x128xf32>
      %34 = arith.addf %31, %33 : vector<128x128xf32>
      %c0_24 = arith.constant 0 : index
      %c0_25 = arith.constant 0 : index
      %35 = vector.load %arg6[%c0_24, %c0_25] : memref<128x128xf32, #tpu.memory_space<vmem>>, vector<128x128xf32>
      tpu.vector_store %arg6[%c0_24, %c0_25], %34 {strides = array<i32>} : memref<128x128xf32, #tpu.memory_space<vmem>>, vector<128x128xf32>,
    } else {
    }
    return
  }
  func.func @transform_0(%arg0: i32, %arg1: i32) -> (i32, i32) {
    %c0_i32 = arith.constant 0 : i32
    return %arg0, %arg1 : i32, i32
  }
  func.func @transform_1(%arg0: i32, %arg1: i32) -> (i32, i32) {
    %c0_i32 = arith.constant 0 : i32
    %c0_i32_0 = arith.constant 0 : i32
    %c0_i32_1 = arith.constant 0 : i32
    return %c0_i32, %c0_i32_0 : i32, i32
  }
  func.func @transform_2(%arg0: i32, %arg1: i32) -> (i32, i32) {
    %c0_i32 = arith.constant 0 : i32
    %c0_i32_0 = arith.constant 0 : i32
    %c0_i32_1 = arith.constant 0 : i32
    return %c0_i32, %c0_i32_0 : i32, i32
  }
  func.func @transform_3(%arg0: i32, %arg1: i32) -> (i32, i32) {
    %c0_i32 = arith.constant 0 : i32
    %c0_i32_0 = arith.constant 0 : i32
    %c0_i32_1 = arith.constant 0 : i32
    return %c0_i32, %c0_i32_0 : i32, i32
  }
  func.func @transform_4(%arg0: i32, %arg1: i32) -> (i32, i32) {
    %c0_i32 = arith.constant 0 : i32
    %c0_i32_0 = arith.constant 0 : i32
    return %arg0, %c0_i32 : i32, i32
  }
}

</mosaic_0001>

<bundles_post_ra>
// kernel: tpu_custom_call.1
= control target key start
LH: loop header
LB: loop body
LE: loop exit
PB: predicated region body
PF: predicated region fallthrough
CT: control target
= control target key end

     0   :  { %9 = vsyncpa [#allocation5], 0  ;;  %s1872_s0 = inlined_call_operand.vmem [shape: s8[256,256], index: 0, kind: input, shape index: {}]   ;;  %s1873_s1 = inlined_call_operand.vmem [shape: bf16[256,64], index: 1, kind: input, shape index: {}]   ;;  %s1874_s2 = inlined_call_operand.vmem [shape: bf16[64,128], index: 2, kind: input, shape index: {}]   ;;  %s1875_s3 = inlined_call_operand.vmem [shape: f32[1,128], index: 3, kind: input, shape index: {}]   ;;  %s1876_s4 = inlined_call_operand.hbm [shape: f32[256,128], index: 4, kind: output, shape index: {}]  }
   0x1   :  { %11 = vsyncpa [#allocation5 + $0x1], 0  ;;  %s1538_s15 = smov 0   ;;  %s1540_s16 = smov 0  }
   0x2   :  { %s1542_s17 = smov 0   ;;  %s1544_s18 = smov 0  }
   0x3   :  { %s1546_s19 = smov 0   ;;  %s1548_s20 = smov 0  }
   0x4 LB: > { %s1156_s21 = sadd.s32 4294967295, %s1506_s20   ;;  %s1157_s22 = sadd.s32 4294967294, %s1506_s20   ;;  %s1506_s20 = sphi %s1548_s20, %s17_s20   ;;  %s1502_s19 = sphi %s1546_s19, %s1883_s19   ;;  %s1498_s18 = sphi %s1544_s18, %s1882_s18   ;;  %s1494_s17 = sphi %s1542_s17, %s1881_s17   ;;  %s1490_s16 = sphi %s1540_s16, %s1880_s16   ;;  %s1486_s15 = sphi %s1538_s15, %s1879_s15  }
   0x5   : > { %s29_s23 = sadd.s32 1, %s1502_s19  ;;  %s127_s24 = sadd.s32 1, %s1494_s17 }
   0x6   : > { %p31_p0 = scmp.ge.s32.totalorder %s29_s23, 2  ;;  %p137_p1 = scmp.ne.s32.totalorder %s1494_s17, %s1490_s16 }
   0x7   : > { %p138_p2 = scmp.eq.s32.totalorder %s1156_s21, 1  ;;  %p143_p3 = scmp.ne.s32.totalorder %s1490_s16, %s1486_s15 }
   0x8   : > { %s1885_s23 = smov (%p31_p0, %s29_s23), 0  ;;  %p144_p5 = scmp.eq.s32.totalorder %s1157_s22, 1 }
   0x9   : > { %p1578_p4 = por %p138_p2, %p137_p1  ;;  %s124_s26 = ssub.s32 %s1502_s19, %s1885_s23 }
   0xa   : > { %p1160_p6 = scmp.ge.s32.totalorder %s1506_s20, 1  ;;  %p125_p7 = scmp.eq.s32.totalorder %s124_s26, 0 }
   0xb   : > { %p1585_p8 = por %p144_p5, %p143_p3  ;;  %p186_p9 = scmp.lt.s32.totalorder %s1506_s20, 3 }
   0xc   : > { %s1591_s28 = scalar_select %p125_p7, %s1494_s17, %s127_s24  }
   0xd   : > { %p187_p10 = pnand %p1160_p6, %p186_p9 }
   0xe   : > { %s1162_s5 = sshll.u32 (!%p187_p10), %s1498_s18, 2  ;;  %s214_s22 = sand.u32 (!%p187_p10), 1, %s1490_s16  }
   0xf   : > { %190 = sbr.rel (%p187_p10) target bundleno = 531 (0x213), region = 36  ;;  %p219_p11 = scmp.lt.s32.totalorder (!%p187_p10), %s1162_s5, 7 }
  0x10   : > { %s1161_s24 = sshll.u32 (!%p187_p10), %s214_s22, 7  ;;  %s1200_s6 = sshll.u32 (!%p187_p10), %s1498_s18, 11 }
  0x11   : > { %s1783_s30 = scalar_lea.vmem (!%p187_p10), [#allocation4], %s1161_s24  ;;  %s1827_s18 = scalar_lea.sflag (!%p187_p10), [#allocation5], %s214_s22 }
  0x12   : > { %s1078_s7 = sshll.u32 (!%p187_p10), %s1783_s30, 4  ;;  %s1510_s11 = smov (!%p187_p10), [#allocation4]   ;;  %s1820_s7 = int_to_ptr.vmem [resolvable:$true] %s1078_s7 }
  0x13   : > { %s1434_s12 = sshll.u32 (!%p187_p10), %s1510_s11, 4  ;;  %s1435_s12 = int_to_ptr.vmem [resolvable:$false] %s1434_s12 }
  0x14   : > { %v1378_v0 = vld [vmem:[%s1873_s1 + $0x78] sm:$0xff]   ;;  %v1380_v2 = vld [vmem:[%s1873_s1 + $0x70] sm:$0xff]   ;;  %v1382_v4 = vld [vmem:[%s1873_s1 + $0x68] sm:$0xff]   ;;  %s1887_s5 = smov (!%p219_p11, %s1162_s5), 7  ;;  %vm235_vm0 = vcmask 523264   ;;  %vm252_vm1 = vcmask 7168   ;;  %p1437_p1 = scmp.lt.s32.totalorder %s1820_s7, %s1435_s12 }
  0x15   : > { %v1379_v1 = vld [vmem:[%s1873_s1 + $0x38] sm:$0xff]   ;;  %1201 = vmatprep.subr.bf16.mxu0 %v1378_v0  ;;  %1301 = vmatprep.subr.bf16.mxu1 %v1378_v0  ;;  %v1381_v3 = vld [vmem:[%s1873_s1 + $0x30] sm:$0xff]   ;;  %v1383_v5 = vld [vmem:[%s1873_s1 + $0x28] sm:$0xff]   ;;  %s1199_s26 = sshll.u32 %s1887_s5, 4  ;;  %s1430_s5 = scalar_lea.vmem %s1820_s7, 2048 }
  0x16   : > { %1202 = vmatpush3.bf16.msra.mxu0 %v1379_v1  ;;  %1309 = vmatpush3.bf16.msra.mxu1 %v1379_v1  ;;  %v1384_v6 = vld [vmem:[%s1873_s1 + $0x60] sm:$0xff]   ;;  %v1386_v8 = vld [vmem:[%s1873_s1 + $0x58] sm:$0xff]   ;;  %s1624_s10 = scalar_lea.vmem %s1872_s0, %s1199_s26  ;;  %v1388_v10 = vld [vmem:[%s1873_s1 + $0x50] sm:$0xff]   ;;  %p1431_p12 = scmp.ne.s32.totalorder %s1820_s7, %s1430_s5 }
  0x17   : > { %1203 = vmatprep.subr.bf16.mxu0 %v1380_v2  ;;  %1302 = vmatprep.subr.bf16.mxu1 %v1380_v2  ;;  %v1385_v7 = vld [vmem:[%s1873_s1 + $0x20] sm:$0xff]   ;;  %v1387_v9 = vld [vmem:[%s1873_s1 + $0x18] sm:$0xff]   ;;  %v270_v11 = vld [vmem:[%s1624_s10 + $0x8] sm:$0xff]  ;;  %s1436_s13 = scalar_lea.vmem %s1435_s12, 4096 }
  0x18   : > { %v269_v12 = vld [vmem:[%s1624_s10] sm:$0xff]  ;;  %v1389_v13 = vld [vmem:[%s1873_s1 + $0x10] sm:$0xff]   ;;  %v278_v14 = vunpack.c.l.s8.bf16 %v270_v11  ;;  %v1390_v15 = vld [vmem:[%s1873_s1 + $0x48] sm:$0xff]   ;;  %v1645_v21 = vunpack.c.h.s8.bf16 %v270_v11  ;;  %p1432_p13 = pnand %p1431_p12, %p1578_p4  ;;  %p1438_p2 = scmp.lt.s32.totalorder %s1436_s13, %s1430_s5 }
  0x19   : > { %v272_v16 = vld [vmem:[%s1624_s10 + $0x18] sm:$0xff]  ;;  %v271_v17 = vld [vmem:[%s1624_s10 + $0x10] sm:$0xff]  ;;  %v277_v19 = vunpack.c.l.s8.bf16 %v269_v12  ;;  %v1647_v22 = vunpack.c.h.s8.bf16 %v269_v12  ;;  %v1391_v31 = vld [vmem:[%s1873_s1 + $0x8] sm:$0xff]  }
  0x1a   : > { %1204 = vmatpush3.bf16.msra.mxu0 %v1381_v3  ;;  %1310 = vmatpush3.bf16.msra.mxu1 %v1381_v3  ;;  %v276_v18 = vld [vmem:[%s1624_s10 + $0x38] sm:$0xff]  ;;  %v589_v24 = vunpack.c.l.bf16 %v278_v14  ;;  %v591_v26 = vunpack.c.h.bf16 %v278_v14  ;;  %v593_v28 = vunpack.c.l.bf16 %v1645_v21  ;;  %v595_v30 = vunpack.c.h.bf16 %v1645_v21  ;;  %v1392_v35 = vld [vmem:[%s1873_s1 + $0x40] sm:$0xff]   ;;  %v274_v46 = vld [vmem:[%s1624_s10 + $0x28] sm:$0xff]  ;;  %p1433_p0 = pneg %p1432_p13  ;;  %p1439_p3 = por %p1438_p2, %p1437_p1 }
  0x1b   : > { %1205 = vmatprep.subr.bf16.mxu0 %v1382_v4  ;;  %1303 = vmatprep.subr.bf16.mxu1 %v1382_v4  ;;  %v1643_v20 = vunpack.c.l.s8.bf16 %v276_v18  ;;  %v588_v23 = vunpack.c.l.bf16 %v277_v19  ;;  %v590_v25 = vunpack.c.h.bf16 %v277_v19  ;;  %v592_v27 = vunpack.c.l.bf16 %v1647_v22  ;;  %v1393_v43 = vld [vmem:[%s1873_s1] sm:$0xff]   ;;  %v275_v48 = vld [vmem:[%s1624_s10 + $0x30] sm:$0xff] }
  0x1c   : > { %474 = vmatprep.mubr.bf16.mxu0 %v278_v14  ;;  %v594_v29 = vunpack.c.h.bf16 %v1647_v22  ;;  %v1657_v32 = vunpack.c.l.s8.bf16 %v272_v16  ;;  %v1659_v33 = vunpack.c.l.s8.bf16 %v271_v17  ;;  %v1671_v44 = vunpack.c.h.s8.bf16 %v272_v16  ;;  %v273_v47 = vld [vmem:[%s1624_s10 + $0x20] sm:$0xff]  ;;  %s1818_s10 = scalar_lea.hbm %s1876_s4, %s1200_s6  ;;  %p1440_p5 = pnand %p1439_p3, %p1433_p0 }
  0x1d   : > { %522 = vmatprep.mubr.bf16.mxu1 %v1643_v20  ;;  %v620_v34 = vadd.f32 %v589_v24, %v588_v23  ;;  %v626_v36 = vadd.f32 %v593_v28, %v592_v27  ;;  %v623_v37 = vadd.f32 %v591_v26, %v590_v25  ;;  %v1673_v45 = vunpack.c.h.s8.bf16 %v271_v17  ;;  %v1394_v25 = vld [vmem:[%s1874_s2 + $0x18] sm:$0xff]   ;;  %v1395_v26 = vld [vmem:[%s1874_s2 + $0x10] sm:$0xff]   ;;  %v1396_v27 = vld [vmem:[%s1874_s2 + $0x8] sm:$0xff]  }
  0x1e   : > { %1206 = vmatpush3.bf16.msra.mxu0 %v1383_v5  ;;  %1311 = vmatpush3.bf16.msra.mxu1 %v1383_v5  ;;  %v596_v38 = vunpack.c.l.bf16 %v1659_v33  ;;  %v597_v39 = vunpack.c.l.bf16 %v1657_v32  ;;  %v629_v40 = vadd.f32 %v595_v30, %v594_v29  ;;  %v598_v41 = vunpack.c.h.bf16 %v1659_v33  ;;  %v1397_v28 = vld [vmem:[%s1874_s2] sm:$0xff]  }
  0x1f   : > { %1207 = vmatprep.subr.bf16.mxu0 %v1384_v6  ;;  %1304 = vmatprep.subr.bf16.mxu1 %v1384_v6  ;;  %v599_v42 = vunpack.c.h.bf16 %v1657_v32  ;;  %v600_v50 = vunpack.c.l.bf16 %v1673_v45  ;;  %v601_v51 = vunpack.c.l.bf16 %v1671_v44  ;;  %v602_v53 = vunpack.c.h.bf16 %v1673_v45 }
  0x20   : > { %621 = vadd.xlane.f32.xlu0 %v620_v34  ;;  %627 = vadd.xlane.f32.xlu1 %v626_v36  ;;  %v632_v49 = vadd.f32 %v597_v39, %v596_v38  ;;  %v603_v54 = vunpack.c.h.bf16 %v1671_v44  ;;  %v286_v55 = vunpack.c.l.s8.bf16 %v274_v46  ;;  %v285_v56 = vunpack.c.l.s8.bf16 %v273_v47 }
  0x21   : > { %v635_v52 = vadd.f32 %v599_v42, %v598_v41  ;;  %v289_v57 = vunpack.c.l.s8.bf16 %v275_v48  ;;  %v292_v58 = vunpack.c.h.s8.bf16 %v276_v18  ;;  %v638_v59 = vadd.f32 %v601_v51, %v600_v50 }
  0x22   : > { %1208 = vmatpush3.bf16.msra.mxu0 %v1385_v7  ;;  %1312 = vmatpush3.bf16.msra.mxu1 %v1385_v7  ;;  %v604_v60 = vunpack.c.l.bf16 %v285_v56  ;;  %v605_v61 = vunpack.c.l.bf16 %v286_v55  ;;  %v641_v62 = vadd.f32 %v603_v54, %v602_v53  ;;  %v606_v63 = vunpack.c.h.bf16 %v285_v56 }
  0x23   : > { %1209 = vmatprep.subr.bf16.mxu0 %v1386_v8  ;;  %1305 = vmatprep.subr.bf16.mxu1 %v1386_v8  ;;  %v607_v0 = vunpack.c.h.bf16 %v286_v55  ;;  %v288_v1 = vunpack.c.h.s8.bf16 %v274_v46  ;;  %v287_v2 = vunpack.c.h.s8.bf16 %v273_v47  ;;  %v612_v11 = vunpack.c.l.bf16 %v289_v57 }
  0x24   : > { %624 = vadd.xlane.f32.xlu0 %v623_v37  ;;  %630 = vadd.xlane.f32.xlu1 %v629_v40  ;;  %v644_v3 = vadd.f32 %v605_v61, %v604_v60  ;;  %v613_v12 = vunpack.c.l.bf16 %v1643_v20  ;;  %v614_v14 = vunpack.c.h.bf16 %v289_v57  ;;  %v617_v18 = vunpack.c.l.bf16 %v292_v58 }
  0x25   : > { %v608_v4 = vunpack.c.l.bf16 %v287_v2  ;;  %v609_v5 = vunpack.c.l.bf16 %v288_v1  ;;  %v647_v6 = vadd.f32 %v607_v0, %v606_v63  ;;  %v610_v7 = vunpack.c.h.bf16 %v287_v2 }
  0x26   : > { %1210 = vmatpush3.bf16.msra.mxu0 %v1387_v9  ;;  %1313 = vmatpush3.bf16.msra.mxu1 %v1387_v9  ;;  %v611_v8 = vunpack.c.h.bf16 %v288_v1  ;;  %v291_v9 = vunpack.c.h.s8.bf16 %v275_v48  ;;  %v656_v16 = vadd.f32 %v613_v12, %v612_v11  ;;  %v619_v23 = vunpack.c.h.bf16 %v292_v58 }
  0x27   : > { %1211 = vmatprep.subr.bf16.mxu0 %v1388_v10  ;;  %1306 = vmatprep.subr.bf16.mxu1 %v1388_v10  ;;  %v650_v10 = vadd.f32 %v609_v5, %v608_v4 }
  0x28   : > { %633 = vadd.xlane.f32.xlu0 %v632_v49  ;;  %636 = vadd.xlane.f32.xlu1 %v635_v52  ;;  %v616_v17 = vunpack.c.l.bf16 %v291_v9 }
  0x2a   : > { %1212 = vmatpush3.bf16.msra.mxu0 %v1389_v13  ;;  %1314 = vmatpush3.bf16.msra.mxu1 %v1389_v13  ;;  %v653_v13 = vadd.f32 %v611_v8, %v610_v7  ;;  %v662_v24 = vadd.f32 %v617_v18, %v616_v17 }
  0x2b   : > { %1213 = vmatprep.subr.bf16.mxu0 %v1390_v15  ;;  %1307 = vmatprep.subr.bf16.mxu1 %v1390_v15  ;;  %v615_v15 = vunpack.c.h.bf16 %v1643_v20  ;;  %v1508_v20 = vmov 0.0  }
  0x2c   : > { %639 = vadd.xlane.f32.xlu0 %v638_v59  ;;  %642 = vadd.xlane.f32.xlu1 %v641_v62  ;;  %236 = vst.msk [vmem:[#allocation2] sm:$0xff] %vm235_vm0, %v1508_v20  ;;  %237 = vst.msk [vmem:[#allocation2 + $0x8] sm:$0xff] %vm235_vm0, %v1508_v20 }
  0x2d   : > { %238 = vst.msk [vmem:[#allocation2 + $0x10] sm:$0xff] %vm235_vm0, %v1508_v20  ;;  %239 = vst.msk [vmem:[#allocation2 + $0x18] sm:$0xff] %vm235_vm0, %v1508_v20 }
  0x2e   : > { %1214 = vmatpush3.bf16.msra.mxu0 %v1391_v31  ;;  %1315 = vmatpush3.bf16.msra.mxu1 %v1391_v31  ;;  %240 = vst.msk [vmem:[#allocation2 + $0x20] sm:$0xff] %vm235_vm0, %v1508_v20  ;;  %241 = vst.msk [vmem:[#allocation2 + $0x28] sm:$0xff] %vm235_vm0, %v1508_v20  ;;  %v1509_v31 = vmov 0  }
  0x2f   : > { %1215 = vmatprep.subr.bf16.mxu0 %v1392_v35  ;;  %1308 = vmatprep.subr.bf16.mxu1 %v1392_v35  ;;  %242 = vst.msk [vmem:[#allocation2 + $0x30] sm:$0xff] %vm235_vm0, %v1508_v20  ;;  %243 = vst.msk [vmem:[#allocation2 + $0x38] sm:$0xff] %vm235_vm0, %v1508_v20 }
  0x30   : > { %645 = vadd.xlane.f32.xlu0 %v644_v3  ;;  %648 = vadd.xlane.f32.xlu1 %v647_v6  ;;  %244 = vst.msk [vmem:[#allocation2 + $0x40] sm:$0xff] %vm235_vm0, %v1508_v20  ;;  %245 = vst.msk [vmem:[#allocation2 + $0x48] sm:$0xff] %vm235_vm0, %v1508_v20 }
  0x31   : > { %246 = vst.msk [vmem:[#allocation2 + $0x50] sm:$0xff] %vm235_vm0, %v1508_v20  ;;  %247 = vst.msk [vmem:[#allocation2 + $0x58] sm:$0xff] %vm235_vm0, %v1508_v20  ;;  %1377 = vset.pattern.permute.xlu1 %v1509_v31  ;;  %1376 = vset.pattern.permute.xlu0 %v1509_v31 }
  0x32   : > { %1216 = vmatpush3.bf16.msra.mxu0 %v1393_v43  ;;  %1316 = vmatpush3.bf16.msra.mxu1 %v1393_v43  ;;  %248 = vst.msk [vmem:[#allocation2 + $0x60] sm:$0xff] %vm235_vm0, %v1508_v20  ;;  %249 = vst.msk [vmem:[#allocation2 + $0x68] sm:$0xff] %vm235_vm0, %v1508_v20 }
  0x33   : > { %250 = vst.msk [vmem:[#allocation2 + $0x70] sm:$0xff] %vm235_vm0, %v1508_v20  ;;  %251 = vst.msk [vmem:[#allocation2 + $0x78] sm:$0xff] %vm235_vm0, %v1508_v20  ;;  %1277 = vmatprep.subr.bf16.mxu1 %v1394_v25 }
  0x34   : > { %651 = vadd.xlane.f32.xlu0 %v650_v10  ;;  %654 = vadd.xlane.f32.xlu1 %v653_v13  ;;  %253 = vst.msk [vmem:[#allocation3] sm:$0xff] %vm252_vm1, %v1508_v20  ;;  %254 = vst.msk [vmem:[#allocation3 + $0x8] sm:$0xff] %vm252_vm1, %v1508_v20 }
  0x35   : > { %475 = vmatmul.mubr.bf16.vlgmr.msra.gmra.mxu0 %v277_v19  ;;  %523 = vmatmul.mubr.bf16.vlgmr.msra.gmra.mxu1 %v289_v57  ;;  %v659_v19 = vadd.f32 %v615_v15, %v614_v14  ;;  %255 = vst.msk [vmem:[#allocation3 + $0x10] sm:$0xff] %vm252_vm1, %v1508_v20  ;;  %256 = vst.msk [vmem:[#allocation3 + $0x18] sm:$0xff] %vm252_vm1, %v1508_v20 }
  0x36   : > { %482 = vmatprep.mubr.bf16.mxu0 %v1645_v21  ;;  %530 = vmatprep.mubr.bf16.mxu1 %v292_v58  ;;  %v618_v21 = vunpack.c.h.bf16 %v291_v9  ;;  %257 = vst.msk [vmem:[#allocation3 + $0x20] sm:$0xff] %vm252_vm1, %v1508_v20  ;;  %258 = vst.msk [vmem:[#allocation3 + $0x28] sm:$0xff] %vm252_vm1, %v1508_v20 }
  0x37   : > { %1278 = vmatpush3.bf16.msra.mxu1 %v1394_v25  ;;  %259 = vst.msk [vmem:[#allocation3 + $0x30] sm:$0xff] %vm252_vm1, %v1508_v20  ;;  %260 = vst.msk [vmem:[#allocation3 + $0x38] sm:$0xff] %vm252_vm1, %v1508_v20 }
  0x38   : > { %657 = vadd.xlane.f32.xlu0 %v656_v16  ;;  %660 = vadd.xlane.f32.xlu1 %v659_v19  ;;  %261 = vst.msk [vmem:[#allocation3 + $0x40] sm:$0xff] %vm252_vm1, %v1508_v20  ;;  %262 = vst.msk [vmem:[#allocation3 + $0x48] sm:$0xff] %vm252_vm1, %v1508_v20 }
  0x39   : > { %1279 = vmatprep.subr.bf16.mxu1 %v1395_v26  ;;  %263 = vst.msk [vmem:[#allocation3 + $0x50] sm:$0xff] %vm252_vm1, %v1508_v20  ;;  %264 = vst.msk [vmem:[#allocation3 + $0x58] sm:$0xff] %vm252_vm1, %v1508_v20 }
  0x3a   : > { %265 = vst.msk [vmem:[#allocation3 + $0x60] sm:$0xff] %vm252_vm1, %v1508_v20  ;;  %266 = vst.msk [vmem:[#allocation3 + $0x68] sm:$0xff] %vm252_vm1, %v1508_v20 }
  0x3b   : > { %1280 = vmatpush3.bf16.msra.mxu1 %v1395_v26  ;;  %267 = vst.msk [vmem:[#allocation3 + $0x70] sm:$0xff] %vm252_vm1, %v1508_v20  ;;  %268 = vst.msk [vmem:[#allocation3 + $0x78] sm:$0xff] %vm252_vm1, %v1508_v20  ;;  %v572_v29 = vld [vmem:[#allocation3] sm:$0xff]  ;;  %v573_v35 = vld [vmem:[#allocation3 + $0x8] sm:$0xff] }
  0x3c   : > { %663 = vadd.xlane.f32.xlu0 %v662_v24  ;;  %1281 = vmatprep.subr.bf16.mxu1 %v1396_v27  ;;  %v574_v30 = vld [vmem:[#allocation3 + $0x10] sm:$0xff]  ;;  %v575_v37 = vld [vmem:[#allocation3 + $0x18] sm:$0xff] }
  0x3d   : > { %483 = vmatmul.mubr.bf16.gmra.mxu0 %v1647_v22  ;;  %531 = vmatmul.mubr.bf16.gmra.mxu1 %v291_v9  ;;  %v665_v22 = vadd.f32 %v619_v23, %v618_v21  ;;  %v576_v42 = vld [vmem:[#allocation3 + $0x20] sm:$0xff]  ;;  %v577_v43 = vld [vmem:[#allocation3 + $0x28] sm:$0xff] }
  0x3e   : > { %490 = vmatprep.mubr.bf16.mxu0 %v1657_v32  ;;  %v578_v48 = vld [vmem:[#allocation3 + $0x30] sm:$0xff]  ;;  %v579_v50 = vld [vmem:[#allocation3 + $0x38] sm:$0xff] }
  0x3f   : > { %666 = vadd.xlane.f32.xlu1 %v665_v22  ;;  %1282 = vmatpush3.bf16.msra.mxu1 %v1396_v27  ;;  %v580_v58 = vld [vmem:[#allocation3 + $0x40] sm:$0xff]  ;;  %v581_v61 = vld [vmem:[#allocation3 + $0x48] sm:$0xff] }
  0x40   : > { %1283 = vmatprep.subr.bf16.mxu1 %v1397_v28  ;;  %v583_v5 = vld [vmem:[#allocation3 + $0x58] sm:$0xff] }
  0x41   : > { %v584_v10 = vld [vmem:[#allocation3 + $0x60] sm:$0xff]  ;;  %v585_v13 = vld [vmem:[#allocation3 + $0x68] sm:$0xff] }
  0x42   : > { %v586_v19 = vld [vmem:[#allocation3 + $0x70] sm:$0xff]  ;;  %v587_v24 = vld [vmem:[#allocation3 + $0x78] sm:$0xff] }
  0x43   : > { %1284 = vmatpush3.bf16.msra.mxu1 %v1397_v28 }
  0x45   : > { %491 = vmatmul.mubr.bf16.gmra.mxu0 %v1659_v33 }
  0x46   : > { %498 = vmatprep.mubr.bf16.mxu0 %v1671_v44 }
  0x4d   : > { %499 = vmatmul.mubr.bf16.gmra.mxu0 %v1673_v45 }
  0x4e   : > { %506 = vmatprep.mubr.bf16.mxu0 %v286_v55 }
  0x55   : > { %507 = vmatmul.mubr.bf16.gmra.mxu0 %v285_v56 }
  0x56   : > { %514 = vmatprep.mubr.bf16.mxu0 %v288_v1 }
  0x5d   : > { %515 = vmatmul.mubr.bf16.gmra.mxu0 %v287_v2  ;;  %v582_v2 = vld [vmem:[#allocation3 + $0x50] sm:$0xff] }
  0xa9   : > { %v622_v32 = vpop.xlane.xlu0 %621  ;;  %v628_v34 = vpop.xlane.xlu1 %627 }
  0xaa   : > { %v668_v33 = vadd.f32 %v622_v32, %v572_v29  ;;  %v670_v36 = vadd.f32 %v628_v34, %v574_v30 }
  0xac   : > { %685 = vst.msk [vmem:[#allocation3] sm:$0xff] %vm252_vm1, %v668_v33  ;;  %687 = vst.msk [vmem:[#allocation3 + $0x10] sm:$0xff] %vm252_vm1, %v670_v36 }
  0xad   : > { %v625_v38 = vpop.xlane.xlu0 %624  ;;  %v631_v40 = vpop.xlane.xlu1 %630 }
  0xae   : > { %v669_v39 = vadd.f32 %v625_v38, %v573_v35  ;;  %v671_v41 = vadd.f32 %v631_v40, %v575_v37 }
  0xb0   : > { %686 = vst.msk [vmem:[#allocation3 + $0x8] sm:$0xff] %vm252_vm1, %v669_v39  ;;  %688 = vst.msk [vmem:[#allocation3 + $0x18] sm:$0xff] %vm252_vm1, %v671_v41 }
  0xb1   : > { %v634_v44 = vpop.xlane.xlu0 %633  ;;  %v637_v46 = vpop.xlane.xlu1 %636 }
  0xb2   : > { %v672_v45 = vadd.f32 %v634_v44, %v576_v42  ;;  %v673_v47 = vadd.f32 %v637_v46, %v577_v43 }
  0xb3   : > { %v881_v49 = vld [vmem:[#allocation3] sm:$0xff]  ;;  %v883_v53 = vld [vmem:[#allocation3 + $0x10] sm:$0xff] }
  0xb4   : > { %689 = vst.msk [vmem:[#allocation3 + $0x20] sm:$0xff] %vm252_vm1, %v672_v45  ;;  %v897_v51 = vmax.f32 %v881_v49, 1.0  ;;  %690 = vst.msk [vmem:[#allocation3 + $0x28] sm:$0xff] %vm252_vm1, %v673_v47  ;;  %v899_v60 = vmax.f32 %v883_v53, 1.0 }
  0xb5   : > { %v640_v52 = vpop.xlane.xlu0 %639  ;;  %v643_v55 = vpop.xlane.xlu1 %642 }
  0xb6   : > { %v674_v54 = vadd.f32 %v640_v52, %v578_v48  ;;  %1398 = vrsqrt.f32 %v897_v51  ;;  %v675_v56 = vadd.f32 %v643_v55, %v579_v50 }
  0xb7   : > { %v882_v57 = vld [vmem:[#allocation3 + $0x8] sm:$0xff]  ;;  %v884_v63 = vld [vmem:[#allocation3 + $0x18] sm:$0xff] }
  0xb8   : > { %691 = vst.msk [vmem:[#allocation3 + $0x30] sm:$0xff] %vm252_vm1, %v674_v54  ;;  %v898_v59 = vmax.f32 %v882_v57, 1.0  ;;  %692 = vst.msk [vmem:[#allocation3 + $0x38] sm:$0xff] %vm252_vm1, %v675_v56  ;;  %v900_v4 = vmax.f32 %v884_v63, 1.0  ;;  %v330_v63 = vld [vmem:[#allocation2] sm:$0xff] }
  0xb9   : > { %v646_v62 = vpop.xlane.xlu0 %645  ;;  %v649_v1 = vpop.xlane.xlu1 %648 }
  0xba   : > { %1400 = vrsqrt.f32 %v898_v59  ;;  %v676_v0 = vadd.f32 %v646_v62, %v580_v58  ;;  %v677_v3 = vadd.f32 %v649_v1, %v581_v61 }
  0xbb   : > { %1402 = vrsqrt.f32 %v899_v60  ;;  %v885_v7 = vld [vmem:[#allocation3 + $0x20] sm:$0xff]  ;;  %v886_v15 = vld [vmem:[#allocation3 + $0x28] sm:$0xff] }
  0xbc   : > { %693 = vst.msk [vmem:[#allocation3 + $0x40] sm:$0xff] %vm252_vm1, %v676_v0  ;;  %694 = vst.msk [vmem:[#allocation3 + $0x48] sm:$0xff] %vm252_vm1, %v677_v3  ;;  %1404 = vrsqrt.f32 %v900_v4  ;;  %v901_v12 = vmax.f32 %v885_v7, 1.0  ;;  %v902_v23 = vmax.f32 %v886_v15, 1.0 }
  0xbd   : > { %v652_v6 = vpop.xlane.xlu0 %651  ;;  %v655_v9 = vpop.xlane.xlu1 %654 }
  0xbe   : > { %v678_v8 = vadd.f32 %v652_v6, %v582_v2  ;;  %v679_v11 = vadd.f32 %v655_v9, %v583_v5  ;;  %1406 = vrsqrt.f32 %v901_v12  ;;  %v342_v2 = vld [vmem:[#allocation2 + $0x60] sm:$0xff]  ;;  %v331_v9 = vld [vmem:[#allocation2 + $0x8] sm:$0xff] }
  0xbf   : > { %v887_v25 = vld [vmem:[#allocation3 + $0x30] sm:$0xff]  ;;  %v888_v34 = vld [vmem:[#allocation3 + $0x38] sm:$0xff] }
  0xc0   : > { %695 = vst.msk [vmem:[#allocation3 + $0x50] sm:$0xff] %vm252_vm1, %v678_v8  ;;  %696 = vst.msk [vmem:[#allocation3 + $0x58] sm:$0xff] %vm252_vm1, %v679_v11  ;;  %v903_v31 = vmax.f32 %v887_v25, 1.0  ;;  %v904_v36 = vmax.f32 %v888_v34, 1.0 }
  0xc1   : > { %v658_v14 = vpop.xlane.xlu0 %657  ;;  %v661_v17 = vpop.xlane.xlu1 %660 }
  0xc2   : > { %v680_v16 = vadd.f32 %v658_v14, %v584_v10  ;;  %v681_v21 = vadd.f32 %v661_v17, %v585_v13  ;;  %v343_v13 = vld [vmem:[#allocation2 + $0x68] sm:$0xff] }
  0xc3   : > { %v1399_v18 = vpop.eup %1398  ;;  %v890_v22 = vld [vmem:[#allocation3 + $0x48] sm:$0xff]  ;;  %v889_v39 = vld [vmem:[#allocation3 + $0x40] sm:$0xff] }
  0xc4   : > { %697 = vst.msk [vmem:[#allocation3 + $0x60] sm:$0xff] %vm252_vm1, %v680_v16  ;;  %931 = vperm.xlu0 %1376, %v1399_v18   ;;  %698 = vst.msk [vmem:[#allocation3 + $0x68] sm:$0xff] %vm252_vm1, %v681_v21  ;;  %v906_v26 = vmax.f32 %v890_v22, 1.0  ;;  %v905_v41 = vmax.f32 %v889_v39, 1.0  ;;  %v344_v22 = vld [vmem:[#allocation2 + $0x70] sm:$0xff] }
  0xc5   : > { %v664_v20 = vpop.xlane.xlu0 %663 }
  0xc6   : > { %v682_v27 = vadd.f32 %v664_v20, %v586_v19  ;;  %1408 = vrsqrt.f32 %v906_v26  ;;  %v332_v19 = vld [vmem:[#allocation2 + $0x10] sm:$0xff] }
  0xc7   : > { %v1401_v29 = vpop.eup %1400  ;;  %1410 = vrsqrt.f32 %v902_v23  ;;  %v892_v32 = vld [vmem:[#allocation3 + $0x58] sm:$0xff]  ;;  %v891_v44 = vld [vmem:[#allocation3 + $0x50] sm:$0xff] }
  0xc8   : > { %v667_v28 = vpop.xlane.xlu1 %666  ;;  %936 = vperm.xlu1 %1377, %v1401_v29   ;;  %699 = vst.msk [vmem:[#allocation3 + $0x70] sm:$0xff] %vm252_vm1, %v682_v27  ;;  %v1403_v33 = vpop.eup %1402  ;;  %v908_v35 = vmax.f32 %v892_v32, 1.0  ;;  %v907_v47 = vmax.f32 %v891_v44, 1.0  ;;  %v333_v29 = vld [vmem:[#allocation2 + $0x18] sm:$0xff] }
  0xc9   : > { %v683_v30 = vadd.f32 %v667_v28, %v587_v24  ;;  %v1405_v38 = vpop.eup %1404 }
  0xca   : > { %1412 = vrsqrt.f32 %v908_v35 }
  0xcb   : > { %700 = vst.msk [vmem:[#allocation3 + $0x78] sm:$0xff] %vm252_vm1, %v683_v30  ;;  %1414 = vrsqrt.f32 %v903_v31  ;;  %v894_v37 = vld [vmem:[#allocation3 + $0x68] sm:$0xff]  ;;  %v1407_v43 = vpop.eup %1406  ;;  %v893_v49 = vld [vmem:[#allocation3 + $0x60] sm:$0xff] }
  0xcc   : > { %941 = vperm.xlu1 %1377, %v1403_v33   ;;  %v910_v40 = vmax.f32 %v894_v37, 1.0  ;;  %v909_v51 = vmax.f32 %v893_v49, 1.0  ;;  %v345_v33 = vld [vmem:[#allocation2 + $0x78] sm:$0xff] }
  0xce   : > { %1416 = vrsqrt.f32 %v910_v40 }
  0xcf   : > { %1418 = vrsqrt.f32 %v904_v36  ;;  %v895_v53 = vld [vmem:[#allocation3 + $0x70] sm:$0xff] }
  0xd0   : > { %946 = vperm.xlu1 %1377, %v1405_v38   ;;  %v911_v55 = vmax.f32 %v895_v53, 1.0  ;;  %v334_v38 = vld [vmem:[#allocation2 + $0x20] sm:$0xff] }
  0xd2   : > { %v896_v42 = vld [vmem:[#allocation3 + $0x78] sm:$0xff] }
  0xd3   : > { %v912_v45 = vmax.f32 %v896_v42, 1.0  ;;  %v1409_v46 = vpop.eup %1408 }
  0xd4   : > { %951 = vperm.xlu1 %1377, %v1407_v43   ;;  %v1411_v48 = vpop.eup %1410  ;;  %976 = vperm.xlu0 %1376, %v1409_v46  }
  0xd5   : > { %1420 = vrsqrt.f32 %v912_v45 }
  0xd6   : > { %1422 = vrsqrt.f32 %v905_v41 }
  0xd7   : > { %v1413_v50 = vpop.eup %1412  ;;  %1424 = vrsqrt.f32 %v907_v47  ;;  %v335_v47 = vld [vmem:[#allocation2 + $0x28] sm:$0xff] }
  0xd8   : > { %956 = vperm.xlu1 %1377, %v1411_v48   ;;  %v1415_v52 = vpop.eup %1414  ;;  %986 = vperm.xlu0 %1376, %v1413_v50   ;;  %1426 = vrsqrt.f32 %v909_v51 }
  0xd9   : > { %1428 = vrsqrt.f32 %v911_v55 }
  0xdb   : > { %v1417_v54 = vpop.eup %1416 }
  0xdc   : > { %961 = vperm.xlu1 %1377, %v1415_v52   ;;  %v1419_v56 = vpop.eup %1418  ;;  %996 = vperm.xlu0 %1376, %v1417_v54   ;;  %v336_v52 = vld [vmem:[#allocation2 + $0x30] sm:$0xff] }
  0xe0   : > { %966 = vperm.xlu1 %1377, %v1419_v56  }
  0xe2   : > { %v1421_v57 = vpop.eup %1420 }
  0xe3   : > { %v1423_v58 = vpop.eup %1422  ;;  %1006 = vperm.xlu0 %1376, %v1421_v57  }
  0xe4   : > { %971 = vperm.xlu1 %1377, %v1423_v58   ;;  %v1425_v59 = vpop.eup %1424 }
  0xe5   : > { %v1427_v60 = vpop.eup %1426 }
  0xe6   : > { %v1429_v4 = vpop.eup %1428 }
  0xe8   : > { %981 = vperm.xlu1 %1377, %v1425_v59  }
  0xec   : > { %991 = vperm.xlu1 %1377, %v1427_v60   ;;  %v337_v60 = vld [vmem:[#allocation2 + $0x38] sm:$0xff] }
  0xf0   : > { %1001 = vperm.xlu1 %1377, %v1429_v4  }
  0xf5   : > { %v1217_v61 = vpop.f32.mrf.mxu0  ;;  %v1253_v62 = vpop.f32.mrf.mxu1 }
  0xf7   : > { %v1218_v0 = vpop.f32.mrf.mxu0  ;;  %v1254_v3 = vpop.f32.mrf.mxu1 }
  0xf8   : > { %v1219_v1 = vadd.f32 %v1218_v0, %v1217_v61  ;;  %v1255_v6 = vadd.f32 %v1254_v3, %v1253_v62 }
  0xf9   : > { %v1220_v5 = vpop.f32.mrf.mxu0  ;;  %v1256_v8 = vpop.f32.mrf.mxu1 }
  0xfa   : > { %v539_v7 = vadd.f32 %v1219_v1, %v330_v63  ;;  %v551_v11 = vadd.f32 %v1255_v6, %v342_v2  ;;  %v338_v1 = vld [vmem:[#allocation2 + $0x40] sm:$0xff] }
  0xfb   : > { %v1221_v10 = vpop.f32.mrf.mxu0  ;;  %v1257_v14 = vpop.f32.mrf.mxu1 }
  0xfc   : > { %556 = vst.msk [vmem:[#allocation2] sm:$0xff] %vm235_vm0, %v539_v7  ;;  %v1222_v12 = vadd.f32 %v1221_v10, %v1220_v5  ;;  %568 = vst.msk [vmem:[#allocation2 + $0x60] sm:$0xff] %vm235_vm0, %v551_v11  ;;  %v1258_v16 = vadd.f32 %v1257_v14, %v1256_v8  ;;  %v340_v14 = vld [vmem:[#allocation2 + $0x50] sm:$0xff] }
  0xfd   : > { %v1223_v15 = vpop.f32.mrf.mxu0  ;;  %v1259_v18 = vpop.f32.mrf.mxu1 }
  0xfe   : > { %v540_v17 = vadd.f32 %v1222_v12, %v331_v9  ;;  %v552_v23 = vadd.f32 %v1258_v16, %v343_v13  ;;  %v339_v9 = vld [vmem:[#allocation2 + $0x48] sm:$0xff] }
  0xff   : > { %v1224_v21 = vpop.f32.mrf.mxu0  ;;  %v1260_v20 = vpop.f32.mrf.mxu1 }
 0x100   : > { %557 = vst.msk [vmem:[#allocation2 + $0x8] sm:$0xff] %vm235_vm0, %v540_v17  ;;  %v1225_v24 = vadd.f32 %v1224_v21, %v1223_v15  ;;  %569 = vst.msk [vmem:[#allocation2 + $0x68] sm:$0xff] %vm235_vm0, %v552_v23  ;;  %v1261_v26 = vadd.f32 %v1260_v20, %v1259_v18 }
 0x101   : > { %v1226_v25 = vpop.f32.mrf.mxu0  ;;  %v1262_v28 = vpop.f32.mrf.mxu1 }
 0x102   : > { %v541_v27 = vadd.f32 %v1225_v24, %v332_v19  ;;  %v553_v31 = vadd.f32 %v1261_v26, %v344_v22  ;;  %v341_v24 = vld [vmem:[#allocation2 + $0x58] sm:$0xff] }
 0x103   : > { %v1227_v30 = vpop.f32.mrf.mxu0  ;;  %v1263_v34 = vpop.f32.mrf.mxu1  ;;  %v704_v40 = vld [vmem:[#allocation2] sm:$0xff] }
 0x104   : > { %558 = vst.msk [vmem:[#allocation2 + $0x10] sm:$0xff] %vm235_vm0, %v541_v27  ;;  %v1228_v32 = vadd.f32 %v1227_v30, %v1226_v25  ;;  %570 = vst.msk [vmem:[#allocation2 + $0x70] sm:$0xff] %vm235_vm0, %v553_v31  ;;  %v1264_v36 = vadd.f32 %v1263_v34, %v1262_v28 }
 0x105   : > { %v1229_v35 = vpop.f32.mrf.mxu0 }
 0x106   : > { %v542_v37 = vadd.f32 %v1228_v32, %v333_v29  ;;  %v554_v42 = vadd.f32 %v1264_v36, %v345_v33  ;;  %v716_v29 = vld [vmem:[#allocation2 + $0x60] sm:$0xff] }
 0x107   : > { %v1230_v39 = vpop.f32.mrf.mxu0  ;;  %v705_v41 = vld [vmem:[#allocation2 + $0x8] sm:$0xff] }
 0x108   : > { %559 = vst.msk [vmem:[#allocation2 + $0x18] sm:$0xff] %vm235_vm0, %v542_v37  ;;  %v1231_v43 = vadd.f32 %v1230_v39, %v1229_v35  ;;  %v720_v44 = vpack.c.bf16 %v705_v41, %v704_v40  ;;  %571 = vst.msk [vmem:[#allocation2 + $0x78] sm:$0xff] %vm235_vm0, %v554_v42  ;;  %v717_v30 = vld [vmem:[#allocation2 + $0x68] sm:$0xff] }
 0x109   : > { %v1232_v45 = vpop.f32.mrf.mxu0  ;;  %v726_v34 = vpack.c.bf16 %v717_v30, %v716_v29 }
 0x10a   : > { %v543_v46 = vadd.f32 %v1231_v43, %v334_v38  ;;  %1285 = vmatprep.mubr.msk.bf16.mxu1 %vm235_vm0, %v720_v44  ;;  %v1780_v43 = vld [vmem:[%s1875_s3] ss:$0 sm:$0xff] }
 0x10b   : > { %v1233_v48 = vpop.f32.mrf.mxu0  ;;  %v706_v54 = vld [vmem:[#allocation2 + $0x10] sm:$0xff] }
 0x10c   : > { %560 = vst.msk [vmem:[#allocation2 + $0x20] sm:$0xff] %vm235_vm0, %v543_v46  ;;  %v1234_v49 = vadd.f32 %v1233_v48, %v1232_v45  ;;  %v718_v35 = vld [vmem:[#allocation2 + $0x70] sm:$0xff] }
 0x10d   : > { %v1235_v50 = vpop.f32.mrf.mxu0 }
 0x10e   : > { %v544_v51 = vadd.f32 %v1234_v49, %v335_v47 }
 0x10f   : > { %v1236_v53 = vpop.f32.mrf.mxu0  ;;  %v707_v55 = vld [vmem:[#allocation2 + $0x18] sm:$0xff] }
 0x110   : > { %561 = vst.msk [vmem:[#allocation2 + $0x28] sm:$0xff] %vm235_vm0, %v544_v51  ;;  %v1237_v56 = vadd.f32 %v1236_v53, %v1235_v50  ;;  %v721_v57 = vpack.c.bf16 %v707_v55, %v706_v54  ;;  %v719_v36 = vld [vmem:[#allocation2 + $0x78] sm:$0xff] }
 0x111   : > { %v1238_v58 = vpop.f32.mrf.mxu0  ;;  %v727_v37 = vpack.c.bf16 %v719_v36, %v718_v35 }
 0x112   : > { %v545_v59 = vadd.f32 %v1237_v56, %v336_v52  ;;  %1286 = vmatmul.mubr.msk.bf16.vlgmr.msra.gmra.mxu1 %vm235_vm0, %v721_v57 }
 0x113   : > { %v1239_v61 = vpop.f32.mrf.mxu0  ;;  %v708_v3 = vld [vmem:[#allocation2 + $0x20] sm:$0xff] }
 0x114   : > { %562 = vst.msk [vmem:[#allocation2 + $0x30] sm:$0xff] %vm235_vm0, %v545_v59  ;;  %v1240_v62 = vadd.f32 %v1239_v61, %v1238_v58 }
 0x115   : > { %v1241_v63 = vpop.f32.mrf.mxu0 }
 0x116   : > { %v546_v0 = vadd.f32 %v1240_v62, %v337_v60 }
 0x117   : > { %v1242_v2 = vpop.f32.mrf.mxu0  ;;  %v709_v4 = vld [vmem:[#allocation2 + $0x28] sm:$0xff] }
 0x118   : > { %563 = vst.msk [vmem:[#allocation2 + $0x38] sm:$0xff] %vm235_vm0, %v546_v0  ;;  %v1243_v5 = vadd.f32 %v1242_v2, %v1241_v63  ;;  %v722_v6 = vpack.c.bf16 %v709_v4, %v708_v3 }
 0x119   : > { %v1244_v7 = vpop.f32.mrf.mxu0 }
 0x11a   : > { %v547_v8 = vadd.f32 %v1243_v5, %v338_v1  ;;  %1289 = vmatprep.mubr.msk.bf16.mxu1 %vm235_vm0, %v722_v6 }
 0x11b   : > { %v1245_v10 = vpop.f32.mrf.mxu0  ;;  %v710_v16 = vld [vmem:[#allocation2 + $0x30] sm:$0xff] }
 0x11c   : > { %564 = vst.msk [vmem:[#allocation2 + $0x40] sm:$0xff] %vm235_vm0, %v547_v8  ;;  %v1246_v11 = vadd.f32 %v1245_v10, %v1244_v7 }
 0x11d   : > { %v1247_v12 = vpop.f32.mrf.mxu0 }
 0x11e   : > { %v548_v13 = vadd.f32 %v1246_v11, %v339_v9 }
 0x11f   : > { %v1248_v15 = vpop.f32.mrf.mxu0  ;;  %v711_v17 = vld [vmem:[#allocation2 + $0x38] sm:$0xff] }
 0x120   : > { %565 = vst.msk [vmem:[#allocation2 + $0x48] sm:$0xff] %vm235_vm0, %v548_v13  ;;  %v1249_v18 = vadd.f32 %v1248_v15, %v1247_v12  ;;  %v723_v19 = vpack.c.bf16 %v711_v17, %v710_v16 }
 0x121   : > { %v1250_v21 = vpop.f32.mrf.mxu0 }
 0x122   : > { %v549_v23 = vadd.f32 %v1249_v18, %v340_v14  ;;  %1290 = vmatmul.mubr.msk.bf16.gmra.mxu1 %vm235_vm0, %v723_v19 }
 0x123   : > { %v1251_v22 = vpop.f32.mrf.mxu0  ;;  %v712_v26 = vld [vmem:[#allocation2 + $0x40] sm:$0xff] }
 0x124   : > { %566 = vst.msk [vmem:[#allocation2 + $0x50] sm:$0xff] %vm235_vm0, %v549_v23  ;;  %v1252_v20 = vadd.f32 %v1251_v22, %v1250_v21 }
 0x126   : > { %v550_v25 = vadd.f32 %v1252_v20, %v341_v24 }
 0x127   : > { %v713_v27 = vld [vmem:[#allocation2 + $0x48] sm:$0xff] }
 0x128   : > { %567 = vst.msk [vmem:[#allocation2 + $0x58] sm:$0xff] %vm235_vm0, %v550_v25  ;;  %v724_v28 = vpack.c.bf16 %v713_v27, %v712_v26 }
 0x12a   : > { %1293 = vmatprep.mubr.msk.bf16.mxu1 %vm235_vm0, %v724_v28 }
 0x12b   : > { %v714_v31 = vld [vmem:[#allocation2 + $0x50] sm:$0xff] }
 0x12f   : > { %v715_v32 = vld [vmem:[#allocation2 + $0x58] sm:$0xff] }
 0x130   : > { %v725_v33 = vpack.c.bf16 %v715_v32, %v714_v31 }
 0x132   : > { %1294 = vmatmul.mubr.msk.bf16.gmra.mxu1 %vm235_vm0, %v725_v33 }
 0x133   : > { %1297 = vmatprep.mubr.msk.bf16.mxu1 %vm235_vm0, %v726_v34 }
 0x13a   : > { %1298 = vmatmul.mubr.msk.bf16.gmra.mxu1 %vm235_vm0, %v727_v37 }
 0x13f   : > { %v932_v44 = vpop.permute.xlu0 %931 }
 0x143   : > { %v937_v38 = vpop.permute.xlu1 %936 }
 0x147   : > { %v942_v39 = vpop.permute.xlu1 %941 }
 0x14b   : > { %v947_v40 = vpop.permute.xlu1 %946 }
 0x14f   : > { %v952_v41 = vpop.permute.xlu1 %951  ;;  %v977_v8 = vpop.permute.xlu0 %976 }
 0x153   : > { %v957_v49 = vpop.permute.xlu1 %956  ;;  %v987_v10 = vpop.permute.xlu0 %986 }
 0x157   : > { %v962_v57 = vpop.permute.xlu1 %961  ;;  %v997_v21 = vpop.permute.xlu0 %996 }
 0x15b   : > { %v967_v58 = vpop.permute.xlu1 %966 }
 0x15e   : > { %v1007_v31 = vpop.permute.xlu0 %1006 }
 0x15f   : > { %v972_v3 = vpop.permute.xlu1 %971 }
 0x163   : > { %v982_v9 = vpop.permute.xlu1 %981 }
 0x167   : > { %v992_v13 = vpop.permute.xlu1 %991 }
 0x16b   : > { %v1002_v20 = vpop.permute.xlu1 %1001 }
 0x1d2   : > { %v1287_v42 = vpop.f32.mrf.mxu1 }
 0x1d3   : > { %v1011_v45 = vmul.f32 %v1287_v42, %v942_v39 }
 0x1d4   : > { %v818_v46 = vpop.f32.mrf.mxu1 }
 0x1d5   : > { %v1034_v47 = vadd.f32 %v1780_v43, %v1011_v45  ;;  %v1009_v48 = vmul.f32 %v932_v44, %v818_v46 }
 0x1d6   : > { %v1288_v50 = vpop.f32.mrf.mxu1 }
 0x1d7   : > { %1050 = vst [vmem:[%s1783_s30 + $0x10] sm:$0xff] %v1034_v47  ;;  %v1032_v51 = vadd.f32 %v1780_v43, %v1009_v48  ;;  %v1012_v52 = vmul.f32 %v1288_v50, %v947_v40 }
 0x1d8   : > { %v821_v53 = vpop.f32.mrf.mxu1 }
 0x1d9   : > { %1048 = vst [vmem:[%s1783_s30] sm:$0xff] %v1032_v51  ;;  %v1035_v54 = vadd.f32 %v1780_v43, %v1012_v52  ;;  %v1010_v55 = vmul.f32 %v937_v38, %v821_v53 }
 0x1db   : > { %1051 = vst [vmem:[%s1783_s30 + $0x18] sm:$0xff] %v1035_v54  ;;  %v1033_v56 = vadd.f32 %v1780_v43, %v1010_v55 }
 0x1dd   : > { %1049 = vst [vmem:[%s1783_s30 + $0x8] sm:$0xff] %v1033_v56 }
 0x1e2   : > { %v1291_v59 = vpop.f32.mrf.mxu1 }
 0x1e3   : > { %v1015_v60 = vmul.f32 %v1291_v59, %v962_v57 }
 0x1e4   : > { %v834_v61 = vpop.f32.mrf.mxu1 }
 0x1e5   : > { %v1038_v62 = vadd.f32 %v1780_v43, %v1015_v60  ;;  %v1013_v63 = vmul.f32 %v952_v41, %v834_v61 }
 0x1e6   : > { %v1292_v0 = vpop.f32.mrf.mxu1 }
 0x1e7   : > { %1054 = vst [vmem:[%s1783_s30 + $0x30] sm:$0xff] %v1038_v62  ;;  %v1036_v1 = vadd.f32 %v1780_v43, %v1013_v63  ;;  %v1016_v2 = vmul.f32 %v1292_v0, %v967_v58 }
 0x1e8   : > { %v837_v4 = vpop.f32.mrf.mxu1 }
 0x1e9   : > { %1052 = vst [vmem:[%s1783_s30 + $0x20] sm:$0xff] %v1036_v1  ;;  %v1039_v5 = vadd.f32 %v1780_v43, %v1016_v2  ;;  %v1014_v6 = vmul.f32 %v957_v49, %v837_v4 }
 0x1eb   : > { %1055 = vst [vmem:[%s1783_s30 + $0x38] sm:$0xff] %v1039_v5  ;;  %v1037_v7 = vadd.f32 %v1780_v43, %v1014_v6 }
 0x1ed   : > { %1053 = vst [vmem:[%s1783_s30 + $0x28] sm:$0xff] %v1037_v7 }
 0x1f2   : > { %v1295_v11 = vpop.f32.mrf.mxu1 }
 0x1f3   : > { %v1019_v12 = vmul.f32 %v1295_v11, %v982_v9 }
 0x1f4   : > { %v850_v14 = vpop.f32.mrf.mxu1 }
 0x1f5   : > { %v1042_v15 = vadd.f32 %v1780_v43, %v1019_v12  ;;  %v1017_v16 = vmul.f32 %v972_v3, %v850_v14 }
 0x1f6   : > { %v1296_v17 = vpop.f32.mrf.mxu1 }
 0x1f7   : > { %1058 = vst [vmem:[%s1783_s30 + $0x50] sm:$0xff] %v1042_v15  ;;  %v1040_v18 = vadd.f32 %v1780_v43, %v1017_v16  ;;  %v1020_v19 = vmul.f32 %v1296_v17, %v987_v10 }
 0x1f8   : > { %v853_v23 = vpop.f32.mrf.mxu1 }
 0x1f9   : > { %1056 = vst [vmem:[%s1783_s30 + $0x40] sm:$0xff] %v1040_v18  ;;  %v1043_v24 = vadd.f32 %v1780_v43, %v1020_v19  ;;  %v1018_v22 = vmul.f32 %v977_v8, %v853_v23 }
 0x1fa   : > { %v1299_v25 = vpop.f32.mrf.mxu1 }
 0x1fb   : > { %1059 = vst [vmem:[%s1783_s30 + $0x58] sm:$0xff] %v1043_v24  ;;  %v1041_v26 = vadd.f32 %v1780_v43, %v1018_v22  ;;  %v1023_v27 = vmul.f32 %v1299_v25, %v1002_v20 }
 0x1fc   : > { %v866_v28 = vpop.f32.mrf.mxu1 }
 0x1fd   : > { %1057 = vst [vmem:[%s1783_s30 + $0x48] sm:$0xff] %v1041_v26  ;;  %v1046_v29 = vadd.f32 %v1780_v43, %v1023_v27  ;;  %v1021_v30 = vmul.f32 %v992_v13, %v866_v28 }
 0x1fe   : > { %v1300_v32 = vpop.f32.mrf.mxu1 }
 0x1ff   : > { %1062 = vst [vmem:[%s1783_s30 + $0x70] sm:$0xff] %v1046_v29  ;;  %v1044_v33 = vadd.f32 %v1780_v43, %v1021_v30  ;;  %v1024_v34 = vmul.f32 %v1300_v32, %v1007_v31 }
 0x200   : > { %v869_v35 = vpop.f32.mrf.mxu1 }
 0x201   : > { %1060 = vst [vmem:[%s1783_s30 + $0x60] sm:$0xff] %v1044_v33  ;;  %v1047_v36 = vadd.f32 %v1780_v43, %v1024_v34  ;;  %v1022_v37 = vmul.f32 %v997_v21, %v869_v35 }
 0x203   : > { %1063 = vst [vmem:[%s1783_s30 + $0x78] sm:$0xff] %v1047_v36  ;;  %v1045_v38 = vadd.f32 %v1780_v43, %v1022_v37 }
 0x205   : > { %1061 = vst [vmem:[%s1783_s30 + $0x68] sm:$0xff] %v1045_v38 }
 0x206   : > { %1443 = shalt.err (!%p1440_p5)
}
 0x207   : > { %s1444_s14 = scalar_lea.hbm %s1818_s10, 2048  ;;  %s1448_s24 = scalar_lea.hbm %s1876_s4, 4096 }
 0x208   : > { %p1445_p6 = scmp.ne.s32.totalorder %s1818_s10, %s1444_s14  ;;  %p1449_p10 = scmp.lt.s32.totalorder %s1818_s10, %s1876_s4 }
 0x209   : > { %p1450_p11 = scmp.lt.s32.totalorder %s1448_s24, %s1444_s14 }
 0x20a   : > { %p1446_p7 = pnand %p1445_p6, %p1578_p4 }
 0x20b   : > { %p1451_p12 = por %p1450_p11, %p1449_p10 }
 0x20c   : > { %p1447_p9 = pneg %p1446_p7 }
 0x20e   : > { %p1452_p13 = pnand %p1451_p12, %p1447_p9 }
 0x210   : > { %1455 = shalt.err (!%p1452_p13)
}
 0x211   : > { %s1511_s30 = smov 128   ;;  %s1512_s6 = smov 8  }
 0x212   : > { %1317 = dma.vmem_to_hbm [thread:$0]  (%p1578_p4), %s1820_s7, 2048, %s1818_s10, %s1827_s18, %s1511_s30, %s1511_s30, %s1512_s6  }
 0x213 PF: > { %p1323_p0 = scmp.ge.s32.totalorder %s1506_s20, 2  ;;  %s1093_s8 = sand.u32 1, %s1486_s15  }
 0x214   : > { %s1094_s9 = scalar_lea.sflag [#allocation5], %s1093_s8 }
 0x215   : > { %p1320_p1 = pnand %p1323_p0, %p1585_p8 }
 0x217   : > { %p1321_p2 = pneg %p1320_p1 }
 0x219   : > { %1481 = dma.done.wait (%p1321_p2), %s1094_s9, 2048  }
 0x21a   : > { %1483 = vsyncadd (%p1321_p2), %s1094_s9, 4294965248  ;;  %s17_s20 = sadd.s32 1, %s1506_s20   ;;  %s1879_s15 = smov %s1490_s16 }
 0x21b   : > { %p14_p3 = scmp.ge.s32.totalorder %s17_s20, 4   ;;  %s1880_s16 = smov %s1494_s17 }
 0x21c   : > { %s1881_s17 = smov %s1591_s28  ;;  %s1882_s18 = smov %s1502_s19 }
 0x21d   : > { %s1883_s19 = smov %s1885_s23  ;;  %16 = sbr.rel (!%p14_p3) target bundleno = 4 (0x4), region = 80 }
 0x222   :  { %1099 = vsyncpa [#allocation5], 1 }
 0x223   :  { %1101 = vsyncpa [#allocation5 + $0x1], 1 }

</bundles_post_ra>
